<compile_context>
chip_gen: v5e
topology: v5e:2x2
jax: 0.10.0
libtpu: 0.0.40
codegen_flags: <defaults>
</compile_context>

<pallas_src>
import functools
import math

import jax
import jax.numpy as jnp
from jax.experimental import pallas as pl
from jax.experimental.pallas import tpu as pltpu

_SUBLANE = 8
_LANE = 128
_MAX_TM_ROWS = 32768          # cap on the row tile
_MAX_TK = 2048                # cap on the K tile when K is split across the grid
_TARGET_TILE_BYTES = 6 * 1024 * 1024   # ~6 MiB per input tile (double-buffered)


def _cdiv(a, b):
    return -(-a // b)


def _round_up(a, b):
    return _cdiv(a, b) * b


def _vmem_budget_bytes():
    """Generation-aware scoped-VMEM budget: half of physical, capped at 64 MiB.

    v5e/v6e (128 MiB physical) -> 64 MiB; v7x (64 MiB physical) -> 32 MiB.
    """
    try:
        phys = int(pltpu.get_tpu_info().vmem_capacity_bytes)
    except Exception:
        phys = 64 * 1024 * 1024          # conservative fallback == v7x physical
    phys = max(phys, 32 * 1024 * 1024)
    return min(phys // 2, 64 * 1024 * 1024)


def _choose_tiles_2d(M, K, itemsize, tile_bytes):
    """Tiles for the lane-reduction layout (M, K), reduce over last axis."""
    # K (lane) axis: one block if a >=64-row tile still fits; else tile K in
    # multiples of 128 and accumulate across the (arbitrary) K grid axis.
    if K * itemsize * 64 <= tile_bytes:
        tk, grid_k = K, 1
    else:
        tk_cap = (tile_bytes // (64 * itemsize)) // _LANE * _LANE
        tk_cap = max(_LANE, min(tk_cap, _MAX_TK))
        grid_k = _cdiv(K, tk_cap)
        tk = _round_up(_cdiv(K, grid_k), _LANE)
        grid_k = _cdiv(K, tk)
        if grid_k == 1:
            tk = K                       # full K in one block -> no masking
    # M (row, sublane) axis.
    tm = tile_bytes // max(tk * itemsize, 1)
    tm = max(_SUBLANE, min(_MAX_TM_ROWS, (tm // _SUBLANE) * _SUBLANE))
    tm = min(tm, _round_up(M, _SUBLANE))
    grid_m = _cdiv(M, tm)
    tm = _round_up(_cdiv(M, grid_m), _SUBLANE)        # rebalance
    grid_m = _cdiv(M, tm)
    # v7x megacore: keep >= 2 parallel row blocks so both TensorCores get work.
    if grid_m == 1 and M >= 2 * _SUBLANE:
        tm = _round_up(_cdiv(M, 2), _SUBLANE)
        grid_m = _cdiv(M, tm)
    return tm, tk, grid_m, grid_k


def _choose_tiles_3d(pre, K, post, itemsize, tile_bytes):
    """Tiles for the sublane-reduction layout (pre, K, post), reduce over K."""
    # post (lane) axis.
    if post * itemsize * _SUBLANE <= tile_bytes:
        tpost, grid_post = post, 1
    else:
        tpost = (tile_bytes // (_SUBLANE * itemsize)) // _LANE * _LANE
        tpost = max(_LANE, tpost)
        grid_post = _cdiv(post, tpost)
        tpost = _round_up(_cdiv(post, grid_post), _LANE)
        grid_post = _cdiv(post, tpost)
        if grid_post == 1:
            tpost = post
    # K (sublane) axis.
    if K * tpost * itemsize <= tile_bytes:
        tk, grid_k = K, 1
    else:
        tk = max(_SUBLANE, (tile_bytes // (tpost * itemsize)) // _SUBLANE * _SUBLANE)
        grid_k = _cdiv(K, tk)
        tk = _round_up(_cdiv(K, grid_k), _SUBLANE)
        grid_k = _cdiv(K, tk)
        if grid_k == 1:
            tk = K
    # pre (leading) axis -- no sublane/lane constraint.
    bpre = max(1, tile_bytes // max(tk * tpost * itemsize, 1))
    bpre = min(bpre, pre)
    grid_pre = _cdiv(pre, bpre)
    bpre = _cdiv(pre, grid_pre)                       # rebalance
    # v7x megacore: expose >= 2 parallel blocks when possible.
    if grid_pre * grid_post == 1 and pre >= 2:
        bpre = _cdiv(pre, 2)
        grid_pre = _cdiv(pre, bpre)
    return bpre, tk, tpost, grid_pre, grid_post, grid_k


def _lp_pool_lane_kernel(p_ref, x_ref, o_ref, acc_ref, *,
                         inv_k, true_k, tk, mask_k):
    # p_ref   : (1, 1) float32 in SMEM (learnable scalar p)
    # x_ref   : (tm, tk) input tile in VMEM (reduce over last / lane axis)
    # o_ref   : (tm, 1) output tile (resident across the K grid axis)
    # acc_ref : (tm, min(tk, 128)) lane-dense f32 partial-sum accumulator
    k_idx = pl.program_id(1)
    nk = pl.num_programs(1)

    p = jnp.maximum(p_ref[0, 0], 1e-6)        # torch.clamp(p, min=1e-6)
    is_p2 = p == 2.0                          # runtime fast-path selector

    @pl.when(k_idx == 0)
    def _init():
        acc_ref[...] = jnp.zeros_like(acc_ref)

    x = x_ref[...].astype(jnp.float32)
    if mask_k:
        # Last K block is ragged: zero out columns beyond the true K so stale
        # VMEM past the array edge cannot corrupt the sum (|0|**p == 0).
        cols = jax.lax.broadcasted_iota(jnp.int32, x.shape, 1) + k_idx * tk
        x = jnp.where(cols < true_k, x, 0.0)

    def _accumulate(v):
        # Pure VPU adds of 128-lane column groups into the lane-dense acc.
        if tk <= _LANE:
            acc_ref[...] += v
            return
        n_full = tk // _LANE
        for g in range(n_full):
            acc_ref[...] += v[:, g * _LANE:(g + 1) * _LANE]
        rem = tk - n_full * _LANE
        if rem:
            acc_ref[:, :rem] += v[:, n_full * _LANE:]

    @pl.when(is_p2)
    def _accum_p2():
        _accumulate(x * x)                    # |x|**2: no EUP work

    @pl.when(jnp.logical_not(is_p2))
    def _accum_general():
        # |x|**p = exp(p*log|x|); log(0) = -inf -> exp(-inf) = 0, as desired.
        _accumulate(jnp.exp(p * jnp.log(jnp.abs(x))))

    @pl.when(k_idx == nk - 1)
    def _finalize():
        # Single cross-lane reduce per row tile; mean over the TRUE K.
        m = jnp.sum(acc_ref[...], axis=-1, keepdims=True) * jnp.float32(inv_k)

        @pl.when(is_p2)
        def _():
            o_ref[...] = jnp.sqrt(m).astype(o_ref.dtype)

        @pl.when(jnp.logical_not(is_p2))
        def _():
            o_ref[...] = jnp.exp(jnp.log(m) * (1.0 / p)).astype(o_ref.dtype)


def _lp_pool_sublane_kernel(p_ref, x_ref, o_ref, acc_ref, *,
                            inv_k, true_k, tk, mask_k):
    # Reduction over the middle (sublane) axis of a (pre, K, post) view,
    # avoiding a wrapper-side transpose (no extra HBM pass).
    # x_ref   : (bpre, tk, tpost) input tile in VMEM
    # o_ref   : (bpre, 1, tpost) output tile (resident across the K grid axis)
    # acc_ref : (bpre, 1, tpost) f32 accumulator (lane-dense)
    k_idx = pl.program_id(2)
    nk = pl.num_programs(2)

    p = jnp.maximum(p_ref[0, 0], 1e-6)
    is_p2 = p == 2.0

    @pl.when(k_idx == 0)
    def _init():
        acc_ref[...] = jnp.zeros_like(acc_ref)

    x = x_ref[...].astype(jnp.float32)
    if mask_k:
        rows = jax.lax.broadcasted_iota(jnp.int32, x.shape, 1) + k_idx * tk
        x = jnp.where(rows < true_k, x, 0.0)

    @pl.when(is_p2)
    def _accum_p2():
        acc_ref[...] += jnp.sum(x * x, axis=1, keepdims=True)

    @pl.when(jnp.logical_not(is_p2))
    def _accum_general():
        acc_ref[...] += jnp.sum(jnp.exp(p * jnp.log(jnp.abs(x))),
                                axis=1, keepdims=True)

    @pl.when(k_idx == nk - 1)
    def _finalize():
        m = acc_ref[...] * jnp.float32(inv_k)

        @pl.when(is_p2)
        def _():
            o_ref[...] = jnp.sqrt(m).astype(o_ref.dtype)

        @pl.when(jnp.logical_not(is_p2))
        def _():
            o_ref[...] = jnp.exp(jnp.log(m) * (1.0 / p)).astype(o_ref.dtype)


def lp_pooling(x, dim, p_param, keepdim=False, *, tile_bytes=None):
    """Pallas implementation of LpPooling.forward(x, dim)."""
    ndim = x.ndim
    dim = dim % ndim
    shape = tuple(int(s) for s in x.shape)
    K = shape[dim]
    pre = int(math.prod(shape[:dim])) if dim > 0 else 1
    post = int(math.prod(shape[dim + 1:])) if dim < ndim - 1 else 1

    itemsize = jnp.dtype(x.dtype).itemsize
    vmem_limit = _vmem_budget_bytes()
    if tile_bytes is None:
        tile_bytes = min(vmem_limit // 4, _TARGET_TILE_BYTES)

    p_arr = jnp.asarray(p_param, jnp.float32).reshape(1, 1)
    n_elems = pre * K * post
    cost = pl.CostEstimate(
        flops=3 * n_elems,
        transcendentals=2 * n_elems,               # upper bound (general-p path)
        bytes_accessed=n_elems * itemsize + pre * post * itemsize,
    )

    if post == 1:
        # Reduction dim is minor (or followed only by size-1 dims): reduce over
        # lanes of a free (M, K) reshape.
        M = pre
        x2 = x.reshape(M, K)
        tm, tk, grid_m, grid_k = _choose_tiles_2d(M, K, itemsize, tile_bytes)
        mask_k = (K % tk) != 0
        kernel = functools.partial(_lp_pool_lane_kernel, inv_k=1.0 / K,
                                   true_k=K, tk=tk, mask_k=mask_k)
        out = pl.pallas_call(
            kernel,
            out_shape=jax.ShapeDtypeStruct((M, 1), x.dtype),
            grid=(grid_m, grid_k),
            in_specs=[
                pl.BlockSpec(memory_space=pltpu.MemorySpace.SMEM),   # scalar p
                pl.BlockSpec((tm, tk), lambda i, k: (i, k)),         # x tile
            ],
            out_specs=pl.BlockSpec((tm, 1), lambda i, k: (i, 0)),
            scratch_shapes=[pltpu.VMEM((tm, min(tk, _LANE)), jnp.float32)],
            compiler_params=pltpu.CompilerParams(
                dimension_semantics=("parallel", "arbitrary"),
                vmem_limit_bytes=int(vmem_limit),
            ),
            cost_estimate=cost,
        )(p_arr, x2)
    else:
        # Non-minor reduction dim: reduce over the sublane axis of a free
        # (pre, K, post) reshape -- no wrapper transpose / extra HBM pass.
        x3 = x.reshape(pre, K, post)
        bpre, tk, tpost, grid_pre, grid_post, grid_k = _choose_tiles_3d(
            pre, K, post, itemsize, tile_bytes)
        mask_k = (K % tk) != 0
        kernel = functools.partial(_lp_pool_sublane_kernel, inv_k=1.0 / K,
                                   true_k=K, tk=tk, mask_k=mask_k)
        out = pl.pallas_call(
            kernel,
            out_shape=jax.ShapeDtypeStruct((pre, 1, post), x.dtype),
            grid=(grid_pre, grid_post, grid_k),
            in_specs=[
                pl.BlockSpec(memory_space=pltpu.MemorySpace.SMEM),
                pl.BlockSpec((bpre, tk, tpost), lambda i, j, k: (i, k, j)),
            ],
            out_specs=pl.BlockSpec((bpre, 1, tpost), lambda i, j, k: (i, 0, j)),
            scratch_shapes=[pltpu.VMEM((bpre, 1, tpost), jnp.float32)],
            compiler_params=pltpu.CompilerParams(
                dimension_semantics=("parallel", "parallel", "arbitrary"),
                vmem_limit_bytes=int(vmem_limit),
            ),
            cost_estimate=cost,
        )(p_arr, x3)

    if keepdim:
        out_shape = shape[:dim] + (1,) + shape[dim + 1:]
    else:
        out_shape = shape[:dim] + shape[dim + 1:]
    return out.reshape(out_shape)


def _reference(x, dim, p_param, keepdim=False):
    p = jnp.maximum(jnp.asarray(p_param, jnp.float32), 1e-6)
    return jnp.power(
        jnp.mean(jnp.power(jnp.abs(x.astype(jnp.float32)), p),
                 axis=dim, keepdims=keepdim),
        1.0 / p).astype(x.dtype)


def _check(out, ref):
    assert out.shape == ref.shape, (out.shape, ref.shape)
    assert jnp.allclose(out, ref, atol=1e-5, rtol=1e-5), \
        float(jnp.max(jnp.abs(out - ref)))


if __name__ == "__main__":
    key = jax.random.PRNGKey(0)
    k0, k1, k2 = jax.random.split(key, 3)

    # Small shape consistent with the module: (batch=2, seq=8, hidden=32).
    x = jax.random.normal(k0, (2, 8, 32), dtype=jnp.float32)

    # 1) Module default init p = 2.0 (p == 2 fast path), minor-dim reduction.
    out = jax.block_until_ready(lp_pooling(x, -1, jnp.float32(2.0)))
    _check(out, _reference(x, -1, 2.0))

    # 2) General-p path, non-minor reduction dim (sublane kernel), keepdim=True.
    out3 = jax.block_until_ready(lp_pooling(x, 1, jnp.float32(3.0), keepdim=True))
    _check(out3, _reference(x, 1, 3.0, keepdim=True))

    # 3) Force K tiling (grid_k > 1), ragged-K in-kernel masking, and the
    #    multi-group lane-dense accumulator via a small tile override.
    xk = jax.random.normal(k1, (2, 8, 544), dtype=jnp.float32)
    outk = jax.block_until_ready(
        lp_pooling(xk, -1, jnp.float32(2.5), tile_bytes=64 * 1024))
    _check(outk, _reference(xk, -1, 2.5))

    # 4) Sublane kernel with tiled post / tiled-and-ragged K (masked).
    xm = jax.random.normal(k2, (2, 44, 160), dtype=jnp.float32)
    outm = jax.block_until_ready(
        lp_pooling(xm, 1, jnp.float32(1.5), tile_bytes=4096))
    _check(outm, _reference(xm, 1, 1.5))

    print("KERNEL_OK")
</pallas_src>

<mosaic_0001>
module attributes {stable_mosaic.version = 11 : i64} {
  func.func @_lp_pool_lane_kernel(%arg0: i32, %arg1: i32, %arg2: memref<1x1xf32, #tpu.memory_space<smem>>, %arg3: memref<8x32xf32, #tpu.memory_space<vmem>>, %arg4: memref<8x1xf32, #tpu.memory_space<vmem>>, %arg5: memref<8x32xf32, #tpu.memory_space<vmem>>) attributes {dimension_semantics = [#tpu.dimension_semantics<parallel>, #tpu.dimension_semantics<arbitrary>], iteration_bounds = array<i64: 2, 1>, scalar_prefetch = 0 : i64, scratch_operands = 1 : i64, tpu.core_type = #tpu.core_type<tc>, window_params = [{transform_indices = @transform_0, window_bounds = array<i64: 1, 1>}, {transform_indices = @transform_1, window_bounds = array<i64: 8, 32>}, {transform_indices = @transform_2, window_bounds = array<i64: 8, 1>}]} {
    %c0 = arith.constant 0 : index
    %c0_0 = arith.constant 0 : index
    %0 = memref.load %arg2[%c0, %c0_0] : memref<1x1xf32, #tpu.memory_space<smem>>
    %cst = arith.constant 9.99999997E-7 : f32
    %1 = arith.maximumf %0, %cst : f32
    %cst_1 = arith.constant 2.000000e+00 : f32
    %2 = arith.cmpf oeq, %1, %cst_1 : f32
    %c0_i32 = arith.constant 0 : i32
    %3 = arith.cmpi eq, %arg1, %c0_i32 : i32
    %4 = arith.extui %3 : i1 to i32
    %c0_i32_2 = arith.constant 0 : i32
    %5 = arith.cmpi ne, %4, %c0_i32_2 : i32
    scf.if %5 {
      %cst_9 = arith.constant 0.000000e+00 : f32
      %15 = vector.broadcast %cst_9 : f32 to vector<8x32xf32>
      %c0_10 = arith.constant 0 : index
      %c0_11 = arith.constant 0 : index
      %16 = vector.load %arg5[%c0_10, %c0_11] : memref<8x32xf32, #tpu.memory_space<vmem>>, vector<8x32xf32>
      tpu.vector_store %arg5[%c0_10, %c0_11], %15 {strides = array<i32>} : memref<8x32xf32, #tpu.memory_space<vmem>>, vector<8x32xf32>,
    } else {
    }
    %c0_3 = arith.constant 0 : index
    %c0_4 = arith.constant 0 : index
    %6 = vector.load %arg3[%c0_3, %c0_4] : memref<8x32xf32, #tpu.memory_space<vmem>>, vector<8x32xf32>
    %7 = arith.extui %2 : i1 to i32
    %c0_i32_5 = arith.constant 0 : i32
    %8 = arith.cmpi ne, %7, %c0_i32_5 : i32
    scf.if %8 {
      %15 = arith.mulf %6, %6 : vector<8x32xf32>
      %c0_9 = arith.constant 0 : index
      %c0_10 = arith.constant 0 : index
      %16 = vector.load %arg5[%c0_9, %c0_10] : memref<8x32xf32, #tpu.memory_space<vmem>>, vector<8x32xf32>
      %17 = arith.addf %16, %15 : vector<8x32xf32>
      %c0_11 = arith.constant 0 : index
      %c0_12 = arith.constant 0 : index
      %18 = vector.load %arg5[%c0_11, %c0_12] : memref<8x32xf32, #tpu.memory_space<vmem>>, vector<8x32xf32>
      tpu.vector_store %arg5[%c0_11, %c0_12], %17 {strides = array<i32>} : memref<8x32xf32, #tpu.memory_space<vmem>>, vector<8x32xf32>,
    } else {
    }
    %true = arith.constant true
    %9 = arith.xori %2, %true : i1
    %10 = arith.extui %9 : i1 to i32
    %c0_i32_6 = arith.constant 0 : i32
    %11 = arith.cmpi ne, %10, %c0_i32_6 : i32
    scf.if %11 {
      %15 = math.absf %6 : vector<8x32xf32>
      %16 = math.log %15 : vector<8x32xf32>
      %17 = vector.broadcast %1 : f32 to vector<8x32xf32>
      %18 = arith.mulf %17, %16 : vector<8x32xf32>
      %19 = math.exp %18 : vector<8x32xf32>
      %c0_9 = arith.constant 0 : index
      %c0_10 = arith.constant 0 : index
      %20 = vector.load %arg5[%c0_9, %c0_10] : memref<8x32xf32, #tpu.memory_space<vmem>>, vector<8x32xf32>
      %21 = arith.addf %20, %19 : vector<8x32xf32>
      %c0_11 = arith.constant 0 : index
      %c0_12 = arith.constant 0 : index
      %22 = vector.load %arg5[%c0_11, %c0_12] : memref<8x32xf32, #tpu.memory_space<vmem>>, vector<8x32xf32>
      tpu.vector_store %arg5[%c0_11, %c0_12], %21 {strides = array<i32>} : memref<8x32xf32, #tpu.memory_space<vmem>>, vector<8x32xf32>,
    } else {
    }
    %c0_i32_7 = arith.constant 0 : i32
    %12 = arith.cmpi eq, %arg1, %c0_i32_7 : i32
    %13 = arith.extui %12 : i1 to i32
    %c0_i32_8 = arith.constant 0 : i32
    %14 = arith.cmpi ne, %13, %c0_i32_8 : i32
    scf.if %14 {
      %c0_9 = arith.constant 0 : index
      %c0_10 = arith.constant 0 : index
      %15 = vector.load %arg5[%c0_9, %c0_10] : memref<8x32xf32, #tpu.memory_space<vmem>>, vector<8x32xf32>
      %cst_11 = arith.constant dense<0.000000e+00> : vector<8xf32>
      %16 = vector.multi_reduction <add>, %15, %cst_11 [1] : vector<8x32xf32> to vector<8xf32>
      %17 = vector.shape_cast %16 : vector<8xf32> to vector<8x1xf32>
      %cst_12 = arith.constant 3.125000e-02 : f32
      %18 = vector.broadcast %cst_12 : f32 to vector<8x1xf32>
      %19 = arith.mulf %17, %18 : vector<8x1xf32>
      %20 = arith.extui %2 : i1 to i32
      %c0_i32_13 = arith.constant 0 : i32
      %21 = arith.cmpi ne, %20, %c0_i32_13 : i32
      scf.if %21 {
        %25 = math.sqrt %19 : vector<8x1xf32>
        %c0_16 = arith.constant 0 : index
        %c0_17 = arith.constant 0 : index
        %26 = vector.load %arg4[%c0_16, %c0_17] : memref<8x1xf32, #tpu.memory_space<vmem>>, vector<8x1xf32>
        tpu.vector_store %arg4[%c0_16, %c0_17], %25 {strides = array<i32>} : memref<8x1xf32, #tpu.memory_space<vmem>>, vector<8x1xf32>,
      } else {
      }
      %true_14 = arith.constant true
      %22 = arith.xori %2, %true_14 : i1
      %23 = arith.extui %22 : i1 to i32
      %c0_i32_15 = arith.constant 0 : i32
      %24 = arith.cmpi ne, %23, %c0_i32_15 : i32
      scf.if %24 {
        %25 = math.log %19 : vector<8x1xf32>
        %cst_16 = arith.constant 1.000000e+00 : f32
        %26 = arith.divf %cst_16, %1 : f32
        %27 = vector.broadcast %26 : f32 to vector<8x1xf32>
        %28 = arith.mulf %25, %27 : vector<8x1xf32>
        %29 = math.exp %28 : vector<8x1xf32>
        %c0_17 = arith.constant 0 : index
        %c0_18 = arith.constant 0 : index
        %30 = vector.load %arg4[%c0_17, %c0_18] : memref<8x1xf32, #tpu.memory_space<vmem>>, vector<8x1xf32>
        tpu.vector_store %arg4[%c0_17, %c0_18], %29 {strides = array<i32>} : memref<8x1xf32, #tpu.memory_space<vmem>>, vector<8x1xf32>,
      } else {
      }
    } else {
    }
    return
  }
  func.func @transform_0(%arg0: i32, %arg1: i32) -> (i32, i32) {
    %c0_i32 = arith.constant 0 : i32
    %c0_i32_0 = arith.constant 0 : i32
    %c0_i32_1 = arith.constant 0 : i32
    return %c0_i32, %c0_i32_0 : i32, i32
  }
  func.func @transform_1(%arg0: i32, %arg1: i32) -> (i32, i32) {
    %c0_i32 = arith.constant 0 : i32
    return %arg0, %arg1 : i32, i32
  }
  func.func @transform_2(%arg0: i32, %arg1: i32) -> (i32, i32) {
    %c0_i32 = arith.constant 0 : i32
    %c0_i32_0 = arith.constant 0 : i32
    return %arg0, %c0_i32 : i32, i32
  }
}

</mosaic_0001>

<bundles_post_ra>
// kernel: tpu_custom_call.1
= control target key start
LH: loop header
LB: loop body
LE: loop exit
PB: predicated region body
PF: predicated region fallthrough
CT: control target
= control target key end

     0   :  { %s629_s0 = inlined_call_operand.<no memory space> [shape: f32[1,1], index: 0, kind: input, shape index: {}]   ;;  %s630_s1 = inlined_call_operand.hbm [shape: f32[16,32], index: 1, kind: input, shape index: {}]   ;;  %s631_s2 = inlined_call_operand.vmem [shape: f32[16,1], index: 2, kind: output, shape index: {}]  }
   0x1   :  { %7 = sst [smem:[#allocation3]] %s629_s0 }
   0x2   :  { %8 = vsyncpa [#allocation5], 0 }
   0x3   :  { %10 = vsyncpa [#allocation5 + $0x1], 0  ;;  %s520_s11 = smov 0   ;;  %s522_s12 = smov 0  }
   0x4   :  { %s524_s13 = smov 0   ;;  %s526_s14 = smov 0  }
   0x5   :  { %s528_s15 = smov 0   ;;  %s530_s16 = smov 0  }
   0x6 LB: > { %s336_s0 = sadd.s32 4294967295, %s498_s16   ;;  %s28_s17 = sadd.s32 1, %s494_s15  ;;  %s498_s16 = sphi %s530_s16, %s16_s16   ;;  %s494_s15 = sphi %s528_s15, %s638_s15   ;;  %s490_s14 = sphi %s526_s14, %s637_s14   ;;  %s486_s13 = sphi %s524_s13, %s636_s13   ;;  %s482_s12 = sphi %s522_s12, %s635_s12   ;;  %s478_s11 = sphi %s520_s11, %s634_s11  }
   0x7   : > { %p30_p0 = scmp.ge.s32.totalorder %s28_s17, 2  ;;  %s58_s18 = sadd.s32 1, %s486_s13 }
   0x8   : > { %p65_p1 = scmp.ne.s32.totalorder %s486_s13, %s482_s12  ;;  %p66_p2 = scmp.eq.s32.totalorder %s498_s16, 0 }
   0x9   : > { %s640_s17 = smov (%p30_p0, %s28_s17), 0  ;;  %p71_p4 = scmp.ne.s32.totalorder %s482_s12, %s478_s11 }
   0xa   : > { %p556_p3 = por %p66_p2, %p65_p1  ;;  %s53_s20 = ssub.s32 %s494_s15, %s640_s17 }
   0xb   : > { %p72_p5 = scmp.eq.s32.totalorder %s336_s0, 0  ;;  %p56_p6 = scmp.eq.s32.totalorder %s53_s20, 0 }
   0xc   : > { %p355_p8 = scmp.lt.s32.totalorder %s498_s16, 2  ;;  %s124_s23 = sand.u32 1, %s486_s13  }
   0xd   : > { %p563_p7 = por %p72_p5, %p71_p4  ;;  %s341_s24 = sshll.u32 %s494_s15, 3 }
   0xe   : > { %s569_s22 = scalar_select %p56_p6, %s486_s13, %s58_s18  }
   0xf   : > { %s340_s25 = sshll.u32 %s124_s23, 3  ;;  %s133_s28 = scalar_lea.hbm %s630_s1, %s341_s24 }
  0x10   : > { %s135_s29 = sshll.u32 %s133_s28, 4  ;;  %s128_s30 = scalar_lea.vmem [#allocation4], %s340_s25  ;;  %s136_s29 = int_to_ptr.hbm [resolvable:$true] %s135_s29 }
  0x11   : > { %s137_s3 = sshll.u32 %s128_s30, 4  ;;  %p352_p9 = pnand %p355_p8, %p556_p3  ;;  %s138_s3 = int_to_ptr.vmem [resolvable:$true] %s137_s3 }
  0x12   : > { %p342_p10 = scmp.ge.s32.totalorder %s498_s16, 1  ;;  %p142_p11 = scmp.lt.s32.totalorder %s498_s16, 3 }
  0x13   : > { %s125_s4 = scalar_lea.sflag [#allocation5], %s124_s23 }
  0x14   : > { %354 = dma.hbm_to_vmem [thread:$0]  (!%p352_p9), %s136_s29, 128, %s138_s3, %s125_s4  }
  0x15   : > { %p143_p12 = pnand %p342_p10, %p142_p11 }
  0x16   : > { %s148_s5 = sand.u32 (!%p143_p12), 1, %s482_s12  }
  0x17   : > { %146 = sbr.rel (%p143_p12) target bundleno = 307 (0x133), region = 28  ;;  %s343_s6 = sshll.u32 (!%p143_p12), %s148_s5, 3 }
  0x18   : > { %s149_s7 = scalar_lea.sflag (!%p143_p12), [#allocation5], %s148_s5  ;;  %s152_s8 = scalar_lea.vmem (!%p143_p12), [#allocation4], %s343_s6 }
  0x1c   : > { %473 = dma.done.wait (%p563_p7), %s149_s7, 128  }
  0x1d   : > { %475 = vsyncadd (%p563_p7), %s149_s7, 4294967168  ;;  %p173_p13 = scmp.lt.s32.totalorder %s490_s14, 1  ;;  %vm184_vm0 = vcmask 261120   ;;  %s177_s9 = sld [smem:[#allocation3]]  ;;  %v500_v0 = vmov 0.0   ;;  %v186_v1 = vld [vmem:[%s152_s8] sm:$0xff] }
  0x1e   : > { %185 = vst.msk [vmem:[#allocation2] sm:$0xff] %vm184_vm0, %v500_v0  ;;  %s501_s19 = smov 1e-06  }
  0x1f   : > { %s642_s14 = smov (!%p173_p13, %s490_s14), 1 }
  0x20   : > { %s344_s10 = sshll.u32 %s642_s14, 3 }
  0x21   : > { %s591_s18 = scalar_lea.vmem %s631_s2, %s344_s10 }
  0x23   : > { %s593_s20 = smax.f32 %s501_s19, %s177_s9 }
  0x24   : > { %p179_p0 = scmp.eq.f32.partialorder %s593_s20, 2.0 }
  0x25   : > { %v190_v2 = vmul.f32 (%p179_p0), %v186_v1, %v186_v1  ;;  %v191_v3 = vld [vmem:[#allocation2] sm:$0xff] (%p179_p0) }
  0x26   : > { %189 = sbr.rel (!%p179_p0) target bundleno = 43 (0x2b), region = 40 }
  0x27   : > { %v192_v4 = vadd.f32 (%p179_p0), %v191_v3, %v190_v2 }
  0x29   : > { %194 = vst.msk [vmem:[#allocation2] sm:$0xff] (%p179_p0), %vm184_vm0, %v192_v4 }
  0x2b PF: > { %197 = sbr.rel (%p179_p0) target bundleno = 73 (0x49), region = 44 }
  0x30   : > { %v198_v5 = vand.u32 2147483647, %v186_v1  ;;  %v201_v7 = vstv %s593_s20  ;;  %v205_v11 = vld [vmem:[#allocation2] sm:$0xff] }
  0x32   : > { %406 = vlog2.f32 %v198_v5 }
  0x38   : > { %v407_v6 = vpop.eup %406 }
  0x39   : > { %v200_v8 = vmul.f32 0.6931472, %v407_v6 }
  0x3b   : > { %v202_v9 = vmul.f32 %v201_v7, %v200_v8 }
  0x3d   : > { %v203_v10 = vmul.f32 1.442695, %v202_v9 }
  0x3f   : > { %408 = vpow2.f32 %v203_v10 }
  0x45   : > { %v409_v12 = vpop.eup %408 }
  0x46   : > { %v206_v13 = vadd.f32 %v409_v12, %v205_v11 }
  0x48   : > { %208 = vst.msk [vmem:[#allocation2] sm:$0xff] %vm184_vm0, %v206_v13 }
  0x49 PF: > { %vm233_vm3 = vcmask (%p179_p0), 7168  }
  0x4f   : > { %v212_v14 = vld [vmem:[#allocation2] sm:$0xff] }
  0x50   : > { %v214_v15 = vsel %vm184_vm0, %v212_v14, 0.0 }
  0x51   : > { %215 = vadd.xlane.f32.xlu0 %v214_v15 }
  0xc1   : > { %220 = sbr.rel (!%p179_p0) target bundleno = 221 (0xdd), region = 52 }
  0xc4   : > { %v216_v16 = vpop.xlane.xlu0 %215 }
  0xc5   : > { %v217_v17 = vmul.f32 0.03125, %v216_v16 }
  0xc7   : > { %410 = vrsqrt.f32 %v217_v17  ;;  %vm228_vm1 = vcmp.eq.f32.partialorder %v217_v17, inf  ;;  %v231_v24 = vand.u32 2147483648, %v217_v17  ;;  %vm230_vm2 = vcmp.eq.f32.partialorder %v217_v17, 0.0 }
  0xcd   : > { %v411_v18 = vpop.eup %410 }
  0xce   : > { %v222_v19 = vmul.f32 %v411_v18, %v217_v17 }
  0xd0   : > { %v223_v20 = vmul.f32 %v411_v18, %v222_v19 }
  0xd2   : > { %v224_v21 = vmul.f32 0.5, %v223_v20 }
  0xd4   : > { %v225_v22 = vsub.f32 1.5, %v224_v21 }
  0xd6   : > { %v226_v23 = vmul.f32 %v411_v18, %v225_v22 }
  0xd8   : > { %v227_v25 = vmul.f32 %v226_v23, %v217_v17 }
  0xda   : > { %v229_v26 = vsel %vm228_vm1, %v217_v17, %v227_v25 }
  0xdb   : > { %v232_v27 = vsel %vm230_vm2, %v231_v24, %v229_v26 }
  0xdc   : > { %234 = vst.msk [vmem:[%s591_s18] sm:$0xff] %vm233_vm3, %v232_v27 }
  0xdd PF: > { %237 = sbr.rel (%p179_p0) target bundleno = 307 (0x133), region = 56 }
  0xe2   : > { %v240_v28 = vstv %s593_s20  ;;  %vm260_vm8 = vcmask 7168  }
  0xe3   : > { %412 = vrcp.f32 %v240_v28  ;;  %v252_v31 = vand.u32 2147483648, %v240_v28  ;;  %vm246_vm4 = vweird.f32 %v240_v28  ;;  %v250_v33 = vand.u32 2147483647, %v240_v28 }
  0xe4   : > { %414 = vlog2.f32 %v217_v17 }
  0xe5   : > { %v253_v35 = vor.u32 1.1754944e-38, %v252_v31  ;;  %vm251_vm7 = vcmp.eq.f32.partialorder %v250_v33, 8.507059e+37 }
  0xe9   : > { %v413_v29 = vpop.eup %412 }
  0xea   : > { %v242_v30 = vmul.f32 %v413_v29, %v240_v28  ;;  %vm247_vm5 = vweird.f32 %v413_v29  ;;  %v415_v39 = vpop.eup %414 }
  0xeb   : > { %vm248_vm6 = vmor %vm246_vm4, %vm247_vm5  ;;  %v239_v40 = vmul.f32 0.6931472, %v415_v39 }
  0xec   : > { %v243_v32 = vsub.f32 1.0, %v242_v30 }
  0xee   : > { %v244_v34 = vmul.f32 %v413_v29, %v243_v32 }
  0xf0   : > { %v245_v36 = vadd.f32 %v413_v29, %v244_v34 }
  0xf2   : > { %v249_v37 = vsel %vm248_vm6, %v413_v29, %v245_v36 }
  0xf3   : > { %v254_v38 = vsel %vm251_vm7, %v253_v35, %v249_v37 }
  0xf4   : > { %347 = vpush %v254_v38 }
 0x125   : > { %s348_s14 = spop %347 }
 0x126   : > { %v256_v41 = vstv %s348_s14 }
 0x127   : > { %v257_v42 = vmul.f32 %v256_v41, %v239_v40 }
 0x129   : > { %v258_v43 = vmul.f32 1.442695, %v257_v42 }
 0x12b   : > { %416 = vpow2.f32 %v258_v43 }
 0x131   : > { %v417_v44 = vpop.eup %416 }
 0x132   : > { %261 = vst.msk [vmem:[%s591_s18] sm:$0xff] %vm260_vm8, %v417_v44 }
 0x133 PF: > { %s16_s16 = sadd.s32 1, %s498_s16   ;;  %s634_s11 = smov %s482_s12 }
 0x134   : > { %p13_p1 = scmp.ge.s32.totalorder %s16_s16, 4   ;;  %s635_s12 = smov %s486_s13 }
 0x135   : > { %s636_s13 = smov %s569_s22  ;;  %s637_s14 = smov %s494_s15 }
 0x136   : > { %s638_s15 = smov %s640_s17  ;;  %15 = sbr.rel (!%p13_p1) target bundleno = 6 (0x6), region = 92 }
 0x13b   :  { %281 = vsyncpa [#allocation5], 1 }
 0x13c   :  { %283 = vsyncpa [#allocation5 + $0x1], 1 }

</bundles_post_ra>
